<compile_context>
chip_gen: v7x
topology: tpu7x:2x2x1
jax: 0.10.0
libtpu: 0.0.40
codegen_flags: <defaults>
</compile_context>

<pallas_src>
import jax
import jax.numpy as jnp
from jax.experimental import pallas as pl
from jax.experimental.pallas import tpu as pltpu


def _round_up(x, m):
    return (x + m - 1) // m * m


def _triplet_kernel(x1_ref, x2_ref, x3_ref, w1_ref, b1_ref, w2_ref, b2_ref,
                    o1_ref, o2_ref, o3_ref):
    # x*_ref : (tm, D)   bf16 flattened input row-tile
    # w1_ref : (D, H1)   bf16;  b1_ref: (1, H1)  f32
    # w2_ref : (H1, Ep)  bf16;  b2_ref: (1, Ep)  f32   (Ep = lane-padded emb dim)
    # o*_ref : (tm, Ep)  f32
    w1 = w1_ref[...]
    b1 = b1_ref[...]
    w2 = w2_ref[...]
    b2 = b2_ref[...]
    # Shared weights applied to each of the three inputs (static unroll: the
    # three MXU matmul chains are independent, so the scheduler can overlap
    # the VPU bias/ReLU of one input with the MXU matmul of the next).
    for x_ref, o_ref in ((x1_ref, o1_ref), (x2_ref, o2_ref), (x3_ref, o3_ref)):
        h = jnp.dot(x_ref[...], w1, preferred_element_type=jnp.float32)
        h = jnp.maximum(h + b1, 0.0)                          # bias + ReLU in f32
        out = jnp.dot(h.astype(w2.dtype), w2, preferred_element_type=jnp.float32)
        o_ref[...] = (out + b2).astype(o_ref.dtype)


def _embed3(x1f, x2f, x3f, w1, b1, w2, b2, *, tm=256):
    """One pallas_call: shared-weight 2-layer MLP on three (B, D) inputs."""
    B, D = x1f.shape
    H1 = w1.shape[1]
    Ep = w2.shape[1]

    # Row tile: multiple of 8 sublanes when tiling; full extent for tiny
    # batches (block_shape == full array dims satisfies the (8,128) rule).
    tm_blk = tm if B >= tm else B
    grid = (pl.cdiv(B, tm_blk),)

    x_spec = pl.BlockSpec((tm_blk, D), lambda i: (i, 0))
    o_spec = pl.BlockSpec((tm_blk, Ep), lambda i: (i, 0))
    # Constant index_map -> weights/biases stay VMEM-resident across the grid.
    w1_spec = pl.BlockSpec((D, H1), lambda i: (0, 0))
    b1_spec = pl.BlockSpec((1, H1), lambda i: (0, 0))
    w2_spec = pl.BlockSpec((H1, Ep), lambda i: (0, 0))
    b2_spec = pl.BlockSpec((1, Ep), lambda i: (0, 0))

    bytes_in = 3 * B * D * x1f.dtype.itemsize
    bytes_w = (D * H1 + H1 * Ep) * w1.dtype.itemsize + (H1 + Ep) * 4
    bytes_out = 3 * B * Ep * 4
    cost = pl.CostEstimate(
        flops=3 * (2 * B * D * H1 + 2 * B * H1 * Ep),
        transcendentals=0,
        bytes_accessed=bytes_in + bytes_w + bytes_out,
    )

    out_shape = jax.ShapeDtypeStruct((B, Ep), jnp.float32)
    return pl.pallas_call(
        _triplet_kernel,
        out_shape=(out_shape, out_shape, out_shape),
        grid_spec=pltpu.PrefetchScalarGridSpec(
            num_scalar_prefetch=0,
            grid=grid,
            in_specs=[x_spec, x_spec, x_spec, w1_spec, b1_spec, w2_spec, b2_spec],
            out_specs=(o_spec, o_spec, o_spec),
        ),
        compiler_params=pltpu.CompilerParams(
            dimension_semantics=("parallel",),   # shards row tiles across TCs (v7x)
            vmem_limit_bytes=32 * 1024 * 1024,
        ),
        cost_estimate=cost,
    )(x1f, x2f, x3f, w1, b1, w2, b2)


def _prep_params(params):
    """Cast / lane-pad the shared MLP weights once (outside the kernel)."""
    w1, b1, w2, b2 = params
    E = w2.shape[1]
    Ep = _round_up(max(E, 128), 128)
    w1b = w1.astype(jnp.bfloat16)
    w2b = jnp.pad(w2, ((0, 0), (0, Ep - E))).astype(jnp.bfloat16)
    b1f = b1.astype(jnp.float32)
    b2p = jnp.pad(b2, ((0, 0), (0, Ep - E))).astype(jnp.float32)
    return w1b, b1f, w2b, b2p, E


def triplet_net_forward(x1, x2, x3, params):
    """TripletNet.forward: apply the shared embedding net to x1, x2, x3."""
    w1b, b1f, w2b, b2p, E = _prep_params(params)
    B = x1.shape[0]

    # Flatten NCHW -> (B, D) (contiguous reshape, no HBM copy); bf16 operands.
    x1f = x1.reshape(B, -1).astype(jnp.bfloat16)
    x2f = x2.reshape(B, -1).astype(jnp.bfloat16)
    x3f = x3.reshape(B, -1).astype(jnp.bfloat16)

    o1, o2, o3 = _embed3(x1f, x2f, x3f, w1b, b1f, w2b, b2p)
    return o1[:, :E], o2[:, :E], o3[:, :E]


def get_embedding(x, params):
    """TripletNet.get_embedding: embedding net on a single input (reuses kernel)."""
    o1, _, _ = triplet_net_forward(x, x, x, params)
    return o1


def init_params(key, in_dim, hidden=128, emb_dim=32):
    k1, k2, k3, k4 = jax.random.split(key, 4)
    w1 = jax.random.normal(k1, (in_dim, hidden), jnp.float32) * 0.02
    b1 = jax.random.normal(k2, (1, hidden), jnp.float32) * 0.01
    w2 = jax.random.normal(k3, (hidden, emb_dim), jnp.float32) * 0.02
    b2 = jax.random.normal(k4, (1, emb_dim), jnp.float32) * 0.01
    return w1, b1, w2, b2


if __name__ == "__main__":
    key = jax.random.PRNGKey(0)
    kx1, kx2, kx3, kp = jax.random.split(key, 4)

    B, C, H, W = 2, 4, 16, 16          # NCHW, like the PyTorch module
    x1 = jax.random.normal(kx1, (B, C, H, W), jnp.float32)
    x2 = jax.random.normal(kx2, (B, C, H, W), jnp.float32)
    x3 = jax.random.normal(kx3, (B, C, H, W), jnp.float32)

    params = init_params(kp, in_dim=C * H * W, hidden=128, emb_dim=32)

    out1, out2, out3 = triplet_net_forward(x1, x2, x3, params)
    jax.block_until_ready((out1, out2, out3))

    # Reference check in plain JAX (f32).
    def ref_embed(x):
        w1, b1, w2, b2 = params
        h = jnp.maximum(x.reshape(x.shape[0], -1) @ w1 + b1, 0.0)
        return h @ w2 + b2

    r1, r2, r3 = ref_embed(x1), ref_embed(x2), ref_embed(x3)
    # bf16 operands (f32 accumulation) -> loosened tolerances vs the f32 ref.
    assert jnp.allclose(out1, r1, atol=5e-2, rtol=5e-2)
    assert jnp.allclose(out2, r2, atol=5e-2, rtol=5e-2)
    assert jnp.allclose(out3, r3, atol=5e-2, rtol=5e-2)

    print("KERNEL_OK")
</pallas_src>

<mosaic_0001>
module attributes {stable_mosaic.version = 11 : i64} {
  func.func @_triplet_kernel(%arg0: i32, %arg1: memref<2x1024xbf16, #tpu.memory_space<vmem>>, %arg2: memref<2x1024xbf16, #tpu.memory_space<vmem>>, %arg3: memref<2x1024xbf16, #tpu.memory_space<vmem>>, %arg4: memref<1024x128xbf16, #tpu.memory_space<vmem>>, %arg5: memref<1x128xf32, #tpu.memory_space<vmem>>, %arg6: memref<128x128xbf16, #tpu.memory_space<vmem>>, %arg7: memref<1x128xf32, #tpu.memory_space<vmem>>, %arg8: memref<2x128xf32, #tpu.memory_space<vmem>>, %arg9: memref<2x128xf32, #tpu.memory_space<vmem>>, %arg10: memref<2x128xf32, #tpu.memory_space<vmem>>) attributes {dimension_semantics = [#tpu.dimension_semantics<parallel>], iteration_bounds = array<i64: 1>, scalar_prefetch = 0 : i64, scratch_operands = 0 : i64, tpu.core_type = #tpu.core_type<tc>, window_params = [{transform_indices = @transform_0, window_bounds = array<i64: 2, 1024>}, {transform_indices = @transform_1, window_bounds = array<i64: 2, 1024>}, {transform_indices = @transform_2, window_bounds = array<i64: 2, 1024>}, {pipeline_mode = #tpu.pipeline_mode<synchronous>, transform_indices = @transform_3, window_bounds = array<i64: 1024, 128>}, {pipeline_mode = #tpu.pipeline_mode<synchronous>, transform_indices = @transform_4, window_bounds = array<i64: 1, 128>}, {pipeline_mode = #tpu.pipeline_mode<synchronous>, transform_indices = @transform_5, window_bounds = array<i64: 128, 128>}, {pipeline_mode = #tpu.pipeline_mode<synchronous>, transform_indices = @transform_6, window_bounds = array<i64: 1, 128>}, {transform_indices = @transform_7, window_bounds = array<i64: 2, 128>}, {transform_indices = @transform_8, window_bounds = array<i64: 2, 128>}, {transform_indices = @transform_9, window_bounds = array<i64: 2, 128>}]} {
    %c0 = arith.constant 0 : index
    %c0_0 = arith.constant 0 : index
    %0 = vector.load %arg4[%c0, %c0_0] : memref<1024x128xbf16, #tpu.memory_space<vmem>>, vector<1024x128xbf16>
    %c0_1 = arith.constant 0 : index
    %c0_2 = arith.constant 0 : index
    %1 = vector.load %arg5[%c0_1, %c0_2] : memref<1x128xf32, #tpu.memory_space<vmem>>, vector<1x128xf32>
    %c0_3 = arith.constant 0 : index
    %c0_4 = arith.constant 0 : index
    %2 = vector.load %arg6[%c0_3, %c0_4] : memref<128x128xbf16, #tpu.memory_space<vmem>>, vector<128x128xbf16>
    %c0_5 = arith.constant 0 : index
    %c0_6 = arith.constant 0 : index
    %3 = vector.load %arg7[%c0_5, %c0_6] : memref<1x128xf32, #tpu.memory_space<vmem>>, vector<1x128xf32>
    %c0_7 = arith.constant 0 : index
    %c0_8 = arith.constant 0 : index
    %4 = vector.load %arg1[%c0_7, %c0_8] : memref<2x1024xbf16, #tpu.memory_space<vmem>>, vector<2x1024xbf16>
    %cst = arith.constant dense<0.000000e+00> : vector<2x128xf32>
    %5 = tpu.matmul %4, %0, %cst {dimension_numbers = #tpu.dot_dimension_numbers<[1], [0], [0], [1], [0, 0, 1, 1], [], []>} : vector<2x1024xbf16>, vector<1024x128xbf16>, vector<2x128xf32> -> vector<2x128xf32>
    %6 = vector.broadcast %1 : vector<1x128xf32> to vector<2x128xf32>
    %7 = arith.addf %5, %6 : vector<2x128xf32>
    %cst_9 = arith.constant 0.000000e+00 : f32
    %8 = vector.broadcast %cst_9 : f32 to vector<2x128xf32>
    %9 = arith.maximumf %7, %8 : vector<2x128xf32>
    %10 = arith.truncf %9 : vector<2x128xf32> to vector<2x128xbf16>
    %cst_10 = arith.constant dense<0.000000e+00> : vector<2x128xf32>
    %11 = tpu.matmul %10, %2, %cst_10 {dimension_numbers = #tpu.dot_dimension_numbers<[1], [0], [0], [1], [0, 0, 1, 1], [], []>} : vector<2x128xbf16>, vector<128x128xbf16>, vector<2x128xf32> -> vector<2x128xf32>
    %12 = vector.broadcast %3 : vector<1x128xf32> to vector<2x128xf32>
    %13 = arith.addf %11, %12 : vector<2x128xf32>
    %c0_11 = arith.constant 0 : index
    %c0_12 = arith.constant 0 : index
    %14 = vector.load %arg8[%c0_11, %c0_12] : memref<2x128xf32, #tpu.memory_space<vmem>>, vector<2x128xf32>
    tpu.vector_store %arg8[%c0_11, %c0_12], %13 {strides = array<i32>} : memref<2x128xf32, #tpu.memory_space<vmem>>, vector<2x128xf32>,
    %c0_13 = arith.constant 0 : index
    %c0_14 = arith.constant 0 : index
    %15 = vector.load %arg2[%c0_13, %c0_14] : memref<2x1024xbf16, #tpu.memory_space<vmem>>, vector<2x1024xbf16>
    %cst_15 = arith.constant dense<0.000000e+00> : vector<2x128xf32>
    %16 = tpu.matmul %15, %0, %cst_15 {dimension_numbers = #tpu.dot_dimension_numbers<[1], [0], [0], [1], [0, 0, 1, 1], [], []>} : vector<2x1024xbf16>, vector<1024x128xbf16>, vector<2x128xf32> -> vector<2x128xf32>
    %17 = vector.broadcast %1 : vector<1x128xf32> to vector<2x128xf32>
    %18 = arith.addf %16, %17 : vector<2x128xf32>
    %cst_16 = arith.constant 0.000000e+00 : f32
    %19 = vector.broadcast %cst_16 : f32 to vector<2x128xf32>
    %20 = arith.maximumf %18, %19 : vector<2x128xf32>
    %21 = arith.truncf %20 : vector<2x128xf32> to vector<2x128xbf16>
    %cst_17 = arith.constant dense<0.000000e+00> : vector<2x128xf32>
    %22 = tpu.matmul %21, %2, %cst_17 {dimension_numbers = #tpu.dot_dimension_numbers<[1], [0], [0], [1], [0, 0, 1, 1], [], []>} : vector<2x128xbf16>, vector<128x128xbf16>, vector<2x128xf32> -> vector<2x128xf32>
    %23 = vector.broadcast %3 : vector<1x128xf32> to vector<2x128xf32>
    %24 = arith.addf %22, %23 : vector<2x128xf32>
    %c0_18 = arith.constant 0 : index
    %c0_19 = arith.constant 0 : index
    %25 = vector.load %arg9[%c0_18, %c0_19] : memref<2x128xf32, #tpu.memory_space<vmem>>, vector<2x128xf32>
    tpu.vector_store %arg9[%c0_18, %c0_19], %24 {strides = array<i32>} : memref<2x128xf32, #tpu.memory_space<vmem>>, vector<2x128xf32>,
    %c0_20 = arith.constant 0 : index
    %c0_21 = arith.constant 0 : index
    %26 = vector.load %arg3[%c0_20, %c0_21] : memref<2x1024xbf16, #tpu.memory_space<vmem>>, vector<2x1024xbf16>
    %cst_22 = arith.constant dense<0.000000e+00> : vector<2x128xf32>
    %27 = tpu.matmul %26, %0, %cst_22 {dimension_numbers = #tpu.dot_dimension_numbers<[1], [0], [0], [1], [0, 0, 1, 1], [], []>} : vector<2x1024xbf16>, vector<1024x128xbf16>, vector<2x128xf32> -> vector<2x128xf32>
    %28 = vector.broadcast %1 : vector<1x128xf32> to vector<2x128xf32>
    %29 = arith.addf %27, %28 : vector<2x128xf32>
    %cst_23 = arith.constant 0.000000e+00 : f32
    %30 = vector.broadcast %cst_23 : f32 to vector<2x128xf32>
    %31 = arith.maximumf %29, %30 : vector<2x128xf32>
    %32 = arith.truncf %31 : vector<2x128xf32> to vector<2x128xbf16>
    %cst_24 = arith.constant dense<0.000000e+00> : vector<2x128xf32>
    %33 = tpu.matmul %32, %2, %cst_24 {dimension_numbers = #tpu.dot_dimension_numbers<[1], [0], [0], [1], [0, 0, 1, 1], [], []>} : vector<2x128xbf16>, vector<128x128xbf16>, vector<2x128xf32> -> vector<2x128xf32>
    %34 = vector.broadcast %3 : vector<1x128xf32> to vector<2x128xf32>
    %35 = arith.addf %33, %34 : vector<2x128xf32>
    %c0_25 = arith.constant 0 : index
    %c0_26 = arith.constant 0 : index
    %36 = vector.load %arg10[%c0_25, %c0_26] : memref<2x128xf32, #tpu.memory_space<vmem>>, vector<2x128xf32>
    tpu.vector_store %arg10[%c0_25, %c0_26], %35 {strides = array<i32>} : memref<2x128xf32, #tpu.memory_space<vmem>>, vector<2x128xf32>,
    return
  }
  func.func @transform_0(%arg0: i32) -> (i32, i32) {
    %c0_i32 = arith.constant 0 : i32
    %c0_i32_0 = arith.constant 0 : i32
    return %arg0, %c0_i32 : i32, i32
  }
  func.func @transform_1(%arg0: i32) -> (i32, i32) {
    %c0_i32 = arith.constant 0 : i32
    %c0_i32_0 = arith.constant 0 : i32
    return %arg0, %c0_i32 : i32, i32
  }
  func.func @transform_2(%arg0: i32) -> (i32, i32) {
    %c0_i32 = arith.constant 0 : i32
    %c0_i32_0 = arith.constant 0 : i32
    return %arg0, %c0_i32 : i32, i32
  }
  func.func @transform_3(%arg0: i32) -> (i32, i32) {
    %c0_i32 = arith.constant 0 : i32
    %c0_i32_0 = arith.constant 0 : i32
    %c0_i32_1 = arith.constant 0 : i32
    return %c0_i32, %c0_i32_0 : i32, i32
  }
  func.func @transform_4(%arg0: i32) -> (i32, i32) {
    %c0_i32 = arith.constant 0 : i32
    %c0_i32_0 = arith.constant 0 : i32
    %c0_i32_1 = arith.constant 0 : i32
    return %c0_i32, %c0_i32_0 : i32, i32
  }
  func.func @transform_5(%arg0: i32) -> (i32, i32) {
    %c0_i32 = arith.constant 0 : i32
    %c0_i32_0 = arith.constant 0 : i32
    %c0_i32_1 = arith.constant 0 : i32
    return %c0_i32, %c0_i32_0 : i32, i32
  }
  func.func @transform_6(%arg0: i32) -> (i32, i32) {
    %c0_i32 = arith.constant 0 : i32
    %c0_i32_0 = arith.constant 0 : i32
    %c0_i32_1 = arith.constant 0 : i32
    return %c0_i32, %c0_i32_0 : i32, i32
  }
  func.func @transform_7(%arg0: i32) -> (i32, i32) {
    %c0_i32 = arith.constant 0 : i32
    %c0_i32_0 = arith.constant 0 : i32
    return %arg0, %c0_i32 : i32, i32
  }
  func.func @transform_8(%arg0: i32) -> (i32, i32) {
    %c0_i32 = arith.constant 0 : i32
    %c0_i32_0 = arith.constant 0 : i32
    return %arg0, %c0_i32 : i32, i32
  }
  func.func @transform_9(%arg0: i32) -> (i32, i32) {
    %c0_i32 = arith.constant 0 : i32
    %c0_i32_0 = arith.constant 0 : i32
    return %arg0, %c0_i32 : i32, i32
  }
}

</mosaic_0001>

<bundles_post_ra>
// kernel: tpu_custom_call.1
= control target key start
LH: loop header
LB: loop body
LE: loop exit
PB: predicated region body
PF: predicated region fallthrough
CT: control target
= control target key end

     0   :  { %15 = vsyncpa [#allocation3], 0  ;;  %s2862_s0 = inlined_call_operand.hbm [shape: bf16[2,1024], index: 0, kind: input, shape index: {}]   ;;  %s2863_s1 = inlined_call_operand.hbm [shape: bf16[2,1024], index: 1, kind: input, shape index: {}]   ;;  %s2864_s2 = inlined_call_operand.hbm [shape: bf16[2,1024], index: 2, kind: input, shape index: {}]   ;;  %s2865_s3 = inlined_call_operand.hbm [shape: bf16[1024,128], index: 3, kind: input, shape index: {}]   ;;  %s2866_s4 = inlined_call_operand.vmem [shape: f32[1,128], index: 4, kind: input, shape index: {}]   ;;  %s2867_s5 = inlined_call_operand.hbm [shape: bf16[128,128], index: 5, kind: input, shape index: {}]   ;;  %s2868_s6 = inlined_call_operand.vmem [shape: f32[1,128], index: 6, kind: input, shape index: {}]   ;;  %s2869_s7 = inlined_call_operand.hbm [shape: f32[2,128], index: 7, kind: output, shape index: {0}]   ;;  %s2870_s8 = inlined_call_operand.hbm [shape: f32[2,128], index: 8, kind: output, shape index: {1}]   ;;  %s2871_s9 = inlined_call_operand.hbm [shape: f32[2,128], index: 9, kind: output, shape index: {2}]  }
   0x1   :  { %16 = vsyncpa [#allocation6], 0 }
   0x2   :  { %17 = vsyncpa [#allocation9], 0 }
   0x3   :  { %18 = vsyncpa [#allocation4], 0 }
   0x4   :  { %19 = vsyncpa [#allocation13], 0  ;;  %s2218_s30 = smov [#allocation5]   ;;  %s2219_s11 = smov [#allocation8]  }
   0x5   :  { %s36_s10 = sshll.u32 %s2218_s30, 4  ;;  %s55_s12 = sshll.u32 %s2219_s11, 4  ;;  %s37_s10 = int_to_ptr.vmem [resolvable:$true] %s36_s10  ;;  %s2281_s12 = int_to_ptr.vmem [resolvable:$true] %s55_s12 }
   0x6   :  { %s2032_s15 = scalar_lea.hbm %s2863_s1, 128 }
   0x7   :  { %p2033_p0 = scmp.ne.s32.totalorder %s2863_s1, %s2032_s15  ;;  %p2036_p1 = scmp.lt.u32.totalorder %s2032_s15, %s2863_s1 }
   0x9   :  { %p2038_p2 = pnand %p2036_p1, %p2033_p0 }
   0xb   :  { %2041 = shalt.err (!%p2038_p2)
}
   0xc   :  { %s2042_s20 = scalar_lea.vmem %s37_s10, 128  ;;  %p2047_p4 = scmp.lt.s32.totalorder %s37_s10, %s37_s10 }
   0xd   :  { %p2043_p3 = scmp.ne.s32.totalorder %s37_s10, %s2042_s20  ;;  %p2048_p5 = scmp.lt.s32.totalorder %s2042_s20, %s2042_s20 }
   0xf   :  { %p2049_p6 = por %p2048_p5, %p2047_p4 }
  0x11   :  { %p2050_p7 = pnand %p2049_p6, %p2043_p3 }
  0x13   :  { %2053 = shalt.err (!%p2050_p7)
}
  0x14   :  { %39 = dma.hbm_to_vmem [thread:$0]  %s2863_s1, 128, %s37_s10, [#allocation6]  }
  0x15   :  { %s2054_s25 = scalar_lea.hbm %s2865_s3, 8192 }
  0x16   :  { %p2055_p8 = scmp.ne.s32.totalorder %s2865_s3, %s2054_s25  ;;  %p2058_p9 = scmp.lt.u32.totalorder %s2054_s25, %s2865_s3 }
  0x18   :  { %p2060_p10 = pnand %p2058_p9, %p2055_p8 }
  0x1a   :  { %2063 = shalt.err (!%p2060_p10)
}
  0x1b   :  { %s2064_s30 = scalar_lea.vmem %s2281_s12, 8192  ;;  %p2069_p12 = scmp.lt.s32.totalorder %s2281_s12, %s2281_s12 }
  0x1c   :  { %p2065_p11 = scmp.ne.s32.totalorder %s2281_s12, %s2064_s30  ;;  %p2070_p13 = scmp.lt.s32.totalorder %s2064_s30, %s2064_s30 }
  0x1e   :  { %p2071_p0 = por %p2070_p13, %p2069_p12 }
  0x20   :  { %p2072_p1 = pnand %p2071_p0, %p2065_p11 }
  0x22   :  { %2075 = shalt.err (!%p2072_p1)
}
  0x23   :  { %s2220_s1 = smov 64   ;;  %s2221_s10 = smov 4  }
  0x24   :  { %61 = dma.hbm_to_vmem [thread:$0]  %s2865_s3, 8192, %s2281_s12, [#allocation9], %s2220_s1, %s2220_s1, %s2221_s10  }
  0x25   :  { %s2222_s14 = smov [#allocation2]   ;;  %s2223_s16 = smov [#allocation7]  }
  0x26   :  { %s26_s15 = sshll.u32 %s2222_s14, 4  ;;  %s46_s17 = sshll.u32 %s2223_s16, 4  ;;  %s27_s15 = int_to_ptr.vmem [resolvable:$true] %s26_s15  ;;  %s47_s17 = int_to_ptr.vmem [resolvable:$true] %s46_s17 }
  0x27   :  { %s2076_s20 = scalar_lea.hbm %s2862_s0, 128 }
  0x28   :  { %p2077_p2 = scmp.ne.s32.totalorder %s2862_s0, %s2076_s20  ;;  %p2080_p3 = scmp.lt.u32.totalorder %s2076_s20, %s2862_s0 }
  0x2a   :  { %p2082_p4 = pnand %p2080_p3, %p2077_p2 }
  0x2c   :  { %2085 = shalt.err (!%p2082_p4)
}
  0x2d   :  { %s2086_s3 = scalar_lea.vmem %s27_s15, 128  ;;  %p2091_p6 = scmp.lt.s32.totalorder %s27_s15, %s27_s15 }
  0x2e   :  { %p2087_p5 = scmp.ne.s32.totalorder %s27_s15, %s2086_s3  ;;  %p2092_p7 = scmp.lt.s32.totalorder %s2086_s3, %s2086_s3 }
  0x30   :  { %p2093_p8 = por %p2092_p7, %p2091_p6 }
  0x32   :  { %p2094_p9 = pnand %p2093_p8, %p2087_p5 }
  0x34   :  { %2097 = shalt.err (!%p2094_p9)
}
  0x35   :  { %29 = dma.hbm_to_vmem [thread:$0]  %s2862_s0, 128, %s27_s15, [#allocation3]  }
  0x36   :  { %s2098_s28 = scalar_lea.hbm %s2864_s2, 128 }
  0x37   :  { %p2099_p10 = scmp.ne.s32.totalorder %s2864_s2, %s2098_s28  ;;  %p2102_p11 = scmp.lt.u32.totalorder %s2098_s28, %s2864_s2 }
  0x39   :  { %p2104_p12 = pnand %p2102_p11, %p2099_p10 }
  0x3b   :  { %2107 = shalt.err (!%p2104_p12)
}
  0x3c   :  { %s2108_s14 = scalar_lea.vmem %s47_s17, 128  ;;  %p2113_p0 = scmp.lt.s32.totalorder %s47_s17, %s47_s17 }
  0x3d   :  { %p2109_p13 = scmp.ne.s32.totalorder %s47_s17, %s2108_s14  ;;  %p2114_p1 = scmp.lt.s32.totalorder %s2108_s14, %s2108_s14 }
  0x3f   :  { %p2115_p2 = por %p2114_p1, %p2113_p0 }
  0x41   :  { %p2116_p3 = pnand %p2115_p2, %p2109_p13 }
  0x43   :  { %2119 = shalt.err (!%p2116_p3)
}
  0x44   :  { %49 = dma.hbm_to_vmem [thread:$0]  %s2864_s2, 128, %s47_s17, [#allocation6]  }
  0x45   :  { %s2224_s16 = smov [#allocation10]   ;;  %s2120_s21 = scalar_lea.hbm %s2867_s5, 1024 }
  0x46   :  { %s69_s18 = sshll.u32 %s2224_s16, 4  ;;  %p2121_p4 = scmp.ne.s32.totalorder %s2867_s5, %s2120_s21  ;;  %s70_s18 = int_to_ptr.vmem [resolvable:$true] %s69_s18 }
  0x47   :  { %p2124_p5 = scmp.lt.u32.totalorder %s2120_s21, %s2867_s5 }
  0x49   :  { %p2126_p6 = pnand %p2124_p5, %p2121_p4 }
  0x4b   :  { %2129 = shalt.err (!%p2126_p6)
}
  0x4c   :  { %s2130_s12 = scalar_lea.vmem %s70_s18, 1024  ;;  %p2135_p8 = scmp.lt.s32.totalorder %s70_s18, %s70_s18 }
  0x4d   :  { %p2131_p7 = scmp.ne.s32.totalorder %s70_s18, %s2130_s12  ;;  %p2136_p9 = scmp.lt.s32.totalorder %s2130_s12, %s2130_s12 }
  0x4f   :  { %p2137_p10 = por %p2136_p9, %p2135_p8 }
  0x51   :  { %p2138_p11 = pnand %p2137_p10, %p2131_p7 }
  0x53   :  { %2141 = shalt.err (!%p2138_p11)
}
  0x54   :  { %75 = dma.hbm_to_vmem [thread:$0]  %s2867_s5, 1024, %s70_s18, [#allocation9], %s2220_s1, %s2220_s1, %s2221_s10  }
  0x55   :  { %2208 = dma.done.wait [#allocation3], 128  }
  0x56   :  { %2209 = vsyncadd [#allocation3], 4294967168 }
  0x57   :  { %2210 = dma.done.wait [#allocation6], 256  }
  0x58   :  { %2211 = vsyncadd [#allocation6], 4294967040 }
  0x59   :  { %2212 = dma.done.wait [#allocation9], 9216  }
  0x5a   :  { %2213 = vsyncadd [#allocation9], 4294958080  ;;  %v2354_v0 = vld [vmem:[#allocation8 + $0x40] sm:$0xff]   ;;  %v2365_v4 = vld [vmem:[#allocation8 + $0x48] sm:$0xff]   ;;  %v2225_v22 = vmov 1966171168   ;;  %v252_v24 = vlaneseq }
  0x5b   :  { %v2356_v1 = vld [vmem:[#allocation8 + $0xc0] sm:$0xff]   ;;  %1588 = vmatprep.subr.bf16.mxu0 %v2354_v0  ;;  %v2368_v5 = vld [vmem:[#allocation8 + $0xc8] sm:$0xff]   ;;  %v2377_v8 = vld [vmem:[#allocation8 + $0x50] sm:$0xff]   ;;  %v250_v23 = vunpack.c.l.s4 %v2225_v22  ;;  %vm2227_vm0 = vmmov 0   ;;  %s2229_s26 = smov [#allocation11]  }
  0x5c   :  { %v2359_v2 = vld [vmem:[#allocation8] sm:$0xff]   ;;  %1610 = vmatprep.subr.bf16.mxu1 %v2356_v1  ;;  %v2371_v6 = vld [vmem:[#allocation8 + $0x8] sm:$0xff]   ;;  %v2380_v9 = vld [vmem:[#allocation8 + $0xd0] sm:$0xff]   ;;  %v253_v30 = vshrl.u32 %v252_v24, 7  ;;  %s1476_s27 = sshll.u32 %s2229_s26, 4  ;;  %s1477_s27 = int_to_ptr.vmem [resolvable:$true] %s1476_s27 }
  0x5d   :  { %v2362_v3 = vld [vmem:[#allocation8 + $0x80] sm:$0xff]   ;;  %1589 = vmatpush3.bf16.msra.mxu0 %v2359_v2  ;;  %v2374_v7 = vld [vmem:[#allocation8 + $0x88] sm:$0xff]   ;;  %v2383_v10 = vld [vmem:[#allocation8 + $0x10] sm:$0xff]   ;;  %v251_v29 = vunpack.c.0.s8 %v250_v23 }
  0x5e   :  { %1611 = vmatpush3.bf16.msra.mxu1 %v2362_v3  ;;  %1590 = vmatprep.subr.bf16.mxu0 %v2365_v4  ;;  %v2386_v11 = vld [vmem:[#allocation8 + $0x90] sm:$0xff]   ;;  %v2389_v12 = vld [vmem:[#allocation8 + $0x58] sm:$0xff]   ;;  %v2401_v16 = vld [vmem:[#allocation8 + $0x60] sm:$0xff]  }
  0x5f   :  { %1612 = vmatprep.subr.bf16.mxu1 %v2368_v5  ;;  %2914 = vst [vmem:[#allocation20_spill] sm:$0xff] %v2389_v12  ;;  %v2392_v13 = vld [vmem:[#allocation8 + $0xd8] sm:$0xff]   ;;  %2916 = vst [vmem:[#allocation22_spill] sm:$0xff] %v2401_v16  ;;  %v2404_v17 = vld [vmem:[#allocation8 + $0xe0] sm:$0xff]   ;;  %v2442_v35 = vsub.s32 %v251_v29, %v253_v30 }
  0x60   :  { %v2395_v14 = vld [vmem:[#allocation8 + $0x18] sm:$0xff]   ;;  %v2407_v18 = vld [vmem:[#allocation8 + $0x20] sm:$0xff]   ;;  %v2413_v20 = vld [vmem:[#allocation8 + $0x68] sm:$0xff]  }
  0x61   :  { %1591 = vmatpush3.bf16.msra.mxu0 %v2371_v6  ;;  %2915 = vst [vmem:[#allocation21_spill] sm:$0xff] %v2395_v14  ;;  %v2398_v15 = vld [vmem:[#allocation8 + $0x98] sm:$0xff]   ;;  %2917 = vst [vmem:[#allocation23_spill] sm:$0xff] %v2407_v18  ;;  %v2410_v19 = vld [vmem:[#allocation8 + $0xa0] sm:$0xff]  }
  0x62   :  { %1613 = vmatpush3.bf16.msra.mxu1 %v2374_v7  ;;  %1592 = vmatprep.subr.bf16.mxu0 %v2377_v8  ;;  %2918 = vst [vmem:[#allocation24_spill] sm:$0xff] %v2413_v20  ;;  %v2416_v21 = vld [vmem:[#allocation8 + $0xe8] sm:$0xff]   ;;  %v2425_v27 = vld [vmem:[#allocation8 + $0x70] sm:$0xff]   ;;  %v2437_v33 = vld [vmem:[#allocation8 + $0x78] sm:$0xff]  }
  0x63   :  { %1614 = vmatprep.subr.bf16.mxu1 %v2380_v9  ;;  %v2419_v25 = vld [vmem:[#allocation8 + $0x28] sm:$0xff]   ;;  %2920 = vst [vmem:[#allocation26_spill] sm:$0xff] %v2425_v27  ;;  %v2428_v28 = vld [vmem:[#allocation8 + $0xf0] sm:$0xff]   ;;  %2922 = vst [vmem:[#allocation28_spill] sm:$0xff] %v2437_v33 }
  0x64   :  { %2919 = vst [vmem:[#allocation25_spill] sm:$0xff] %v2419_v25  ;;  %v2422_v26 = vld [vmem:[#allocation8 + $0xa8] sm:$0xff]   ;;  %v2431_v31 = vld [vmem:[#allocation8 + $0x30] sm:$0xff]   ;;  %v2440_v34 = vld [vmem:[#allocation8 + $0xf8] sm:$0xff]  }
  0x65   :  { %1593 = vmatpush3.bf16.msra.mxu0 %v2383_v10  ;;  %2921 = vst [vmem:[#allocation27_spill] sm:$0xff] %v2431_v31  ;;  %v2434_v32 = vld [vmem:[#allocation8 + $0xb0] sm:$0xff]   ;;  %v2445_v36 = vld [vmem:[#allocation8 + $0x38] sm:$0xff]   ;;  %v240_v38 = vld [vmem:[#allocation2] sm:$0xff] }
  0x66   :  { %1615 = vmatpush3.bf16.msra.mxu1 %v2386_v11  ;;  %1594 = vmatprep.subr.bf16.mxu0 %v2389_v12  ;;  %2923 = vst [vmem:[#allocation29_spill] sm:$0xff] %v2445_v36  ;;  %v2448_v37 = vld [vmem:[#allocation8 + $0xb8] sm:$0xff]   ;;  %v248_v39 = vcombine.high %v240_v38, %v240_v38  ;;  %v255_v40 = vrot.slane %v240_v38, %v2442_v35  ;;  %v2453_v41 = vld [vmem:[#allocation8 + $0x140] sm:$0xff]   ;;  %v2470_v51 = vld [vmem:[#allocation8 + $0x148] sm:$0xff]  }
  0x67   :  { %1616 = vmatprep.subr.bf16.mxu1 %v2392_v13  ;;  %2924 = vst [vmem:[#allocation30_spill] sm:$0xff] %v2453_v41  ;;  %v2455_v42 = vld [vmem:[#allocation8 + $0x1c0] sm:$0xff]   ;;  %v2472_v53 = vld [vmem:[#allocation8 + $0x1c8] sm:$0xff]   ;;  %v2481_v58 = vld [vmem:[#allocation8 + $0x150] sm:$0xff]  }
  0x68   :  { %v263_v43 = vcombine.high %v255_v40, %v255_v40  ;;  %v271_v44 = vrot.slane %v255_v40, %v2442_v35  ;;  %v2460_v45 = vrot.slane %v248_v39, %v2442_v35  ;;  %v2463_v46 = vld [vmem:[#allocation8 + $0x100] sm:$0xff]   ;;  %v2475_v55 = vld [vmem:[#allocation8 + $0x108] sm:$0xff]   ;;  %2925 = vst [vmem:[#allocation31_spill] sm:$0xff] %v2481_v58  ;;  %v2484_v59 = vld [vmem:[#allocation8 + $0x1d0] sm:$0xff]  }
  0x69   :  { %1595 = vmatpush3.bf16.msra.mxu0 %v2395_v14  ;;  %v2466_v48 = vld [vmem:[#allocation8 + $0x180] sm:$0xff]   ;;  %v2478_v56 = vld [vmem:[#allocation8 + $0x188] sm:$0xff]   ;;  %v2487_v60 = vld [vmem:[#allocation8 + $0x110] sm:$0xff]  }
  0x6a   :  { %1617 = vmatpush3.bf16.msra.mxu1 %v2398_v15  ;;  %1596 = vmatprep.subr.bf16.mxu0 %v2401_v16  ;;  %v285_v47 = vrot.slane %v263_v43, %v2442_v35  ;;  %v264_v49 = vcombine.high %v2460_v45, %v2460_v45  ;;  %v293_v50 = vcombine.high %v271_v44, %v271_v44  ;;  %v2490_v61 = vld [vmem:[#allocation8 + $0x190] sm:$0xff]   ;;  %v2493_v62 = vld [vmem:[#allocation8 + $0x158] sm:$0xff]   ;;  %v2505_v24 = vld [vmem:[#allocation8 + $0x160] sm:$0xff]  }
  0x6b   :  { %1618 = vmatprep.subr.bf16.mxu1 %v2404_v17  ;;  %2926 = vst [vmem:[#allocation32_spill] sm:$0xff] %v2487_v60  ;;  %2927 = vst [vmem:[#allocation33_spill] sm:$0xff] %v2493_v62  ;;  %v2496_v63 = vld [vmem:[#allocation8 + $0x1d8] sm:$0xff]   ;;  %v2508_v29 = vld [vmem:[#allocation8 + $0x1e0] sm:$0xff]  }
  0x6c   :  { %721 = vmatprep.mubr.bf16.mxu0 %v285_v47  ;;  %v295_v52 = vcombine.high %v285_v47, %v285_v47  ;;  %v292_v54 = vrot.slane %v264_v49, %v2442_v35  ;;  %v2499_v22 = vld [vmem:[#allocation8 + $0x118] sm:$0xff]   ;;  %2929 = vst [vmem:[#allocation35_spill] sm:$0xff] %v2505_v24  ;;  %2930 = vst [vmem:[#allocation36_spill] sm:$0xff] %v2508_v29  ;;  %v2511_v30 = vld [vmem:[#allocation8 + $0x120] sm:$0xff]  }
  0x6d   :  { %1597 = vmatpush3.bf16.msra.mxu0 %v2407_v18  ;;  %2928 = vst [vmem:[#allocation34_spill] sm:$0xff] %v2499_v22  ;;  %v2502_v23 = vld [vmem:[#allocation8 + $0x198] sm:$0xff]   ;;  %2931 = vst [vmem:[#allocation37_spill] sm:$0xff] %v2511_v30  ;;  %v2514_v38 = vld [vmem:[#allocation8 + $0x1a0] sm:$0xff]  }
  0x6e   :  { %1619 = vmatpush3.bf16.msra.mxu1 %v2410_v19  ;;  %1598 = vmatprep.subr.bf16.mxu0 %v2413_v20  ;;  %v296_v57 = vcombine.high %v292_v54, %v292_v54  ;;  %2932 = vst [vmem:[#allocation38_spill] sm:$0xff] %v2514_v38  ;;  %v2517_v39 = vld [vmem:[#allocation8 + $0x168] sm:$0xff]   ;;  %v2529_v47 = vld [vmem:[#allocation8 + $0x170] sm:$0xff]  }
  0x6f   :  { %1620 = vmatprep.subr.bf16.mxu1 %v2416_v21  ;;  %761 = vmatprep.mubr.bf16.mxu1 %v295_v52  ;;  %2933 = vst [vmem:[#allocation39_spill] sm:$0xff] %v2517_v39  ;;  %v2520_v40 = vld [vmem:[#allocation8 + $0x1e8] sm:$0xff]   ;;  %2937 = vst [vmem:[#allocation43_spill] sm:$0xff] %v2529_v47  ;;  %v2532_v49 = vld [vmem:[#allocation8 + $0x1f0] sm:$0xff]  }
  0x70   :  { %2934 = vst [vmem:[#allocation40_spill] sm:$0xff] %v2520_v40  ;;  %v2523_v43 = vld [vmem:[#allocation8 + $0x128] sm:$0xff]   ;;  %v2538_v52 = vld [vmem:[#allocation8 + $0x1b0] sm:$0xff]  }
  0x71   :  { %1599 = vmatpush3.bf16.msra.mxu0 %v2419_v25  ;;  %2935 = vst [vmem:[#allocation41_spill] sm:$0xff] %v2523_v43 }
  0x72   :  { %1621 = vmatpush3.bf16.msra.mxu1 %v2422_v26  ;;  %1600 = vmatprep.subr.bf16.mxu0 %v2425_v27 }
  0x73   :  { %1622 = vmatprep.subr.bf16.mxu1 %v2428_v28 }
  0x75   :  { %1601 = vmatpush3.bf16.msra.mxu0 %v2431_v31 }
  0x76   :  { %1623 = vmatpush3.bf16.msra.mxu1 %v2434_v32  ;;  %1602 = vmatprep.subr.bf16.mxu0 %v2437_v33 }
  0x77   :  { %1624 = vmatprep.subr.bf16.mxu1 %v2440_v34 }
  0x79   :  { %1603 = vmatpush3.bf16.msra.mxu0 %v2445_v36 }
  0x7a   :  { %1625 = vmatpush3.bf16.msra.mxu1 %v2448_v37  ;;  %1632 = vmatprep.subr.bf16.mxu0 %v2453_v41 }
  0x7b   :  { %1654 = vmatprep.subr.bf16.mxu1 %v2455_v42 }
  0x7c   :  { %722 = vmatmul.mubr.bf16.vlgmr.msra.gmra.mrb[0].mxu0 %v271_v44  ;;  %v2526_v44 = vld [vmem:[#allocation8 + $0x1a8] sm:$0xff]  }
  0x7d   :  { %1633 = vmatpush3.bf16.msra.mxu0 %v2463_v46  ;;  %762 = vmatmul.mubr.bf16.vlgmr.msra.gmra.mrb[0].mxu1 %v293_v50  ;;  %2936 = vst [vmem:[#allocation42_spill] sm:$0xff] %v2526_v44  ;;  %v2535_v50 = vld [vmem:[#allocation8 + $0x130] sm:$0xff]  }
  0x7e   :  { %1634 = vmatprep.subr.bf16.mxu0 %v2470_v51  ;;  %1655 = vmatpush3.bf16.msra.mxu1 %v2466_v48  ;;  %2938 = vst [vmem:[#allocation44_spill] sm:$0xff] %v2535_v50 }
  0x7f   :  { %801 = vmatprep.mubr.bf16.mxu0 %v292_v54  ;;  %1656 = vmatprep.subr.bf16.mxu1 %v2472_v53  ;;  %v2541_v54 = vld [vmem:[#allocation8 + $0x178] sm:$0xff]  }
  0x80   :  { %841 = vmatprep.mubr.bf16.mxu1 %v296_v57  ;;  %2939 = vst [vmem:[#allocation45_spill] sm:$0xff] %v2541_v54  ;;  %v2544_v57 = vld [vmem:[#allocation8 + $0x1f8] sm:$0xff]  }
  0x81   :  { %1635 = vmatpush3.bf16.msra.mxu0 %v2475_v55 }
  0x82   :  { %1636 = vmatprep.subr.bf16.mxu0 %v2481_v58  ;;  %1657 = vmatpush3.bf16.msra.mxu1 %v2478_v56 }
  0x83   :  { %1658 = vmatprep.subr.bf16.mxu1 %v2484_v59 }
  0x85   :  { %1637 = vmatpush3.bf16.msra.mxu0 %v2487_v60 }
  0x86   :  { %1638 = vmatprep.subr.bf16.mxu0 %v2493_v62  ;;  %1659 = vmatpush3.bf16.msra.mxu1 %v2490_v61 }
  0x87   :  { %1660 = vmatprep.subr.bf16.mxu1 %v2496_v63 }
  0x89   :  { %1639 = vmatpush3.bf16.msra.mxu0 %v2499_v22 }
  0x8a   :  { %1640 = vmatprep.subr.bf16.mxu0 %v2505_v24  ;;  %1661 = vmatpush3.bf16.msra.mxu1 %v2502_v23 }
  0x8b   :  { %1662 = vmatprep.subr.bf16.mxu1 %v2508_v29  ;;  %v278_v29 = vrot.slane %v2460_v45, %v2442_v35  ;;  %v2576_v45 = vld [vmem:[#allocation10] sm:$0xff]  }
  0x8c   :  { %2941 = vst [vmem:[#allocation47_spill] sm:$0xff] %v2576_v45 }
  0x8d   :  { %1641 = vmatpush3.bf16.msra.mxu0 %v2511_v30 }
  0x8e   :  { %1642 = vmatprep.subr.bf16.mxu0 %v2517_v39  ;;  %1663 = vmatpush3.bf16.msra.mxu1 %v2514_v38  ;;  %v2547_v38 = vld [vmem:[#allocation8 + $0x138] sm:$0xff]  }
  0x8f   :  { %1664 = vmatprep.subr.bf16.mxu1 %v2520_v40  ;;  %2940 = vst [vmem:[#allocation46_spill] sm:$0xff] %v2547_v38  ;;  %v2550_v40 = vld [vmem:[#allocation8 + $0x1b8] sm:$0xff]  }
  0x91   :  { %1643 = vmatpush3.bf16.msra.mxu0 %v2523_v43 }
  0x92   :  { %1644 = vmatprep.subr.bf16.mxu0 %v2529_v47  ;;  %1665 = vmatpush3.bf16.msra.mxu1 %v2526_v44  ;;  %v294_v44 = vcombine.high %v278_v29, %v278_v29 }
  0x93   :  { %1666 = vmatprep.subr.bf16.mxu1 %v2532_v49 }
  0x95   :  { %1645 = vmatpush3.bf16.msra.mxu0 %v2535_v50 }
  0x96   :  { %1646 = vmatprep.subr.bf16.mxu0 %v2541_v54  ;;  %1667 = vmatpush3.bf16.msra.mxu1 %v2538_v52 }
  0x97   :  { %1668 = vmatprep.subr.bf16.mxu1 %v2544_v57 }
  0x99   :  { %1647 = vmatpush3.bf16.msra.mxu0 %v2547_v38 }
  0x9a   :  { %1669 = vmatpush3.bf16.msra.mxu1 %v2550_v40 }
  0x9b   :  { %1685 = vmatprep.subr.bf16.mxu1 %v2354_v0 }
  0x9c   :  { %802 = vmatmul.mubr.bf16.vlgmr.msra.gmra.mrb[4].mxu0 %v278_v29  ;;  %v2891_v29 = vmov 0.0  }
  0x9d   :  { %842 = vmatmul.mubr.bf16.vlgmr.msra.gmra.mrb[4].mxu1 %v294_v44  ;;  %1879 = vmatprep.subr.bf16.mxu0 %v2891_v29  ;;  %v2580_v44 = vld [vmem:[#allocation10 + $0x8] sm:$0xff]  }
  0x9e   :  { %1686 = vmatpush3.bf16.msra.mxu1 %v2359_v2  ;;  %1880 = vmatpush3.bf16.msra.mxu0 %v2576_v45  ;;  %2942 = vst [vmem:[#allocation48_spill] sm:$0xff] %v2580_v44 }
  0x9f   :  { %1687 = vmatprep.subr.bf16.mxu1 %v2365_v4  ;;  %1881 = vmatprep.subr.bf16.mxu0 %v2891_v29 }
  0xa0   :  { %1895 = vmatprep.mubr.msk.bf16.mxu0 %vm2227_vm0, %v2891_v29 }
  0xa2   :  { %1688 = vmatpush3.bf16.msra.mxu1 %v2371_v6  ;;  %1882 = vmatpush3.bf16.msra.mxu0 %v2580_v44 }
  0xa3   :  { %1689 = vmatprep.subr.bf16.mxu1 %v2377_v8  ;;  %1883 = vmatprep.subr.bf16.mxu0 %v2891_v29 }
  0xa6   :  { %1690 = vmatpush3.bf16.msra.mxu1 %v2383_v10 }
  0xa7   :  { %1691 = vmatprep.subr.bf16.mxu1 %v2389_v12 }
  0xaa   :  { %1692 = vmatpush3.bf16.msra.mxu1 %v2395_v14 }
  0xab   :  { %1693 = vmatprep.subr.bf16.mxu1 %v2401_v16 }
  0xae   :  { %1694 = vmatpush3.bf16.msra.mxu1 %v2407_v18 }
  0xaf   :  { %1695 = vmatprep.subr.bf16.mxu1 %v2413_v20  ;;  %v946_v20 = vld [vmem:[#allocation5] sm:$0xff] }
  0xb0   :  { %v955_v18 = vrot.slane %v946_v20, %v2442_v35 }
  0xb2   :  { %1696 = vmatpush3.bf16.msra.mxu1 %v2419_v25  ;;  %v2605_v25 = vld [vmem:[#allocation10 + $0x38] sm:$0xff]   ;;  %v963_v16 = vcombine.high %v955_v18, %v955_v18  ;;  %v2616_v12 = vrot.slane %v955_v18, %v2442_v35 }
  0xb3   :  { %1697 = vmatprep.subr.bf16.mxu1 %v2425_v27  ;;  %v2601_v27 = vld [vmem:[#allocation10 + $0x30] sm:$0xff]   ;;  %2948 = vst [vmem:[#allocation54_spill] sm:$0xff] %v2605_v25 }
  0xb4   :  { %2947 = vst [vmem:[#allocation53_spill] sm:$0xff] %v2601_v27  ;;  %v2613_v14 = vrot.slane %v963_v16, %v2442_v35  ;;  %v948_v16 = vcombine.high %v946_v20, %v946_v20 }
  0xb6   :  { %1698 = vmatpush3.bf16.msra.mxu1 %v2431_v31  ;;  %v2584_v31 = vld [vmem:[#allocation10 + $0x10] sm:$0xff]   ;;  %1037 = vmatprep.mubr.bf16.mxu1 %v2613_v14  ;;  %v962_v18 = vrot.slane %v948_v16, %v2442_v35 }
  0xb7   :  { %1699 = vmatprep.subr.bf16.mxu1 %v2437_v33  ;;  %2943 = vst [vmem:[#allocation49_spill] sm:$0xff] %v2584_v31  ;;  %1884 = vmatpush3.bf16.msra.mxu0 %v2584_v31  ;;  %v2597_v33 = vld [vmem:[#allocation10 + $0x28] sm:$0xff]  }
  0xb8   :  { %1885 = vmatprep.subr.bf16.mxu0 %v2891_v29  ;;  %2946 = vst [vmem:[#allocation52_spill] sm:$0xff] %v2597_v33 }
  0xba   :  { %1700 = vmatpush3.bf16.msra.mxu1 %v2445_v36  ;;  %v2592_v36 = vld [vmem:[#allocation10 + $0x20] sm:$0xff]  }
  0xbb   :  { %1729 = vmatprep.subr.bf16.mxu1 %v2453_v41  ;;  %v2588_v41 = vld [vmem:[#allocation10 + $0x18] sm:$0xff]   ;;  %2945 = vst [vmem:[#allocation51_spill] sm:$0xff] %v2592_v36 }
  0xbc   :  { %2944 = vst [vmem:[#allocation50_spill] sm:$0xff] %v2588_v41  ;;  %1886 = vmatpush3.bf16.msra.mxu0 %v2588_v41 }
  0xbd   :  { %1887 = vmatprep.subr.bf16.mxu0 %v2891_v29  ;;  %1038 = vmatmul.mubr.bf16.vlgmr.msra.gmra.mrb[8].mxu1 %v2616_v12 }
  0xbe   :  { %1730 = vmatpush3.bf16.msra.mxu1 %v2463_v46 }
  0xbf   :  { %1731 = vmatprep.subr.bf16.mxu1 %v2470_v51 }
  0xc0   :  { %1888 = vmatpush3.bf16.msra.mxu0 %v2592_v36 }
  0xc1   :  { %1889 = vmatprep.subr.bf16.mxu0 %v2891_v29 }
  0xc2   :  { %1732 = vmatpush3.bf16.msra.mxu1 %v2475_v55 }
  0xc3   :  { %1733 = vmatprep.subr.bf16.mxu1 %v2481_v58 }
  0xc4   :  { %1890 = vmatpush3.bf16.msra.mxu0 %v2597_v33 }
  0xc5   :  { %1891 = vmatprep.subr.bf16.mxu0 %v2891_v29 }
  0xc6   :  { %1734 = vmatpush3.bf16.msra.mxu1 %v2487_v60 }
  0xc7   :  { %1735 = vmatprep.subr.bf16.mxu1 %v2493_v62 }
  0xc8   :  { %1892 = vmatpush3.bf16.msra.mxu0 %v2601_v27 }
  0xc9   :  { %1893 = vmatprep.subr.bf16.mxu0 %v2891_v29  ;;  %v964_v29 = vcombine.high %v962_v18, %v962_v18 }
  0xca   :  { %1736 = vmatpush3.bf16.msra.mxu1 %v2499_v22 }
  0xcb   :  { %1737 = vmatprep.subr.bf16.mxu1 %v2505_v24  ;;  %v2636_v22 = vrot.slane %v964_v29, %v2442_v35  ;;  %v2666_v29 = vld [vmem:[%s2866_s4] ss:$0 sm:$0xff] }
  0xcc   :  { %1894 = vmatpush3.bf16.msra.mxu0 %v2605_v25 }
  0xcd   :  { %1707 = vmatprep.subr.bf16.mxu0 %v2356_v1  ;;  %1117 = vmatprep.mubr.bf16.mxu1 %v2636_v22 }
  0xce   :  { %1738 = vmatpush3.bf16.msra.mxu1 %v2511_v30  ;;  %v2640_v30 = vrot.slane %v962_v18, %v2442_v35 }
  0xcf   :  { %1739 = vmatprep.subr.bf16.mxu1 %v2517_v39 }
  0xd2   :  { %1740 = vmatpush3.bf16.msra.mxu1 %v2523_v43  ;;  %v2949_v43 = vmov 0.0  }
  0xd3   :  { %1741 = vmatprep.subr.bf16.mxu1 %v2529_v47 }
  0xd6   :  { %1742 = vmatpush3.bf16.msra.mxu1 %v2535_v50 }
  0xd7   :  { %1743 = vmatprep.subr.bf16.mxu1 %v2541_v54 }
  0xda   :  { %1744 = vmatpush3.bf16.msra.mxu1 %v2547_v38 }
  0xdb   :  { %1899 = vmatprep.subr.bf16.mxu1 %v2949_v43 }
  0xdd   :  { %1118 = vmatmul.mubr.bf16.vlgmr.msra.gmra.mrb[12].mxu1 %v2640_v30 }
  0xde   :  { %1900 = vmatpush3.bf16.msra.mxu1 %v2576_v45  ;;  %1915 = vmatprep.mubr.msk.bf16.mxu1 %vm2227_vm0, %v2949_v43 }
  0xdf   :  { %1901 = vmatprep.subr.bf16.mxu1 %v2949_v43 }
  0xe2   :  { %1902 = vmatpush3.bf16.msra.mxu1 %v2580_v44 }
  0xe3   :  { %1903 = vmatprep.subr.bf16.mxu1 %v2949_v43 }
  0xe6   :  { %1904 = vmatpush3.bf16.msra.mxu1 %v2584_v31 }
  0xe7   :  { %1905 = vmatprep.subr.bf16.mxu1 %v2949_v43 }
  0xea   :  { %1906 = vmatpush3.bf16.msra.mxu1 %v2588_v41 }
  0xeb   :  { %1907 = vmatprep.subr.bf16.mxu1 %v2949_v43 }
  0xee   :  { %1908 = vmatpush3.bf16.msra.mxu1 %v2592_v36 }
  0xef   :  { %1909 = vmatprep.subr.bf16.mxu1 %v2949_v43 }
  0xf2   :  { %1910 = vmatpush3.bf16.msra.mxu1 %v2597_v33 }
  0xf3   :  { %1911 = vmatprep.subr.bf16.mxu1 %v2949_v43 }
  0xf6   :  { %1912 = vmatpush3.bf16.msra.mxu1 %v2601_v27 }
  0xf7   :  { %1913 = vmatprep.subr.bf16.mxu1 %v2949_v43 }
  0xfa   :  { %1914 = vmatpush3.bf16.msra.mxu1 %v2605_v25 }
  0xfb   :  { %1804 = vmatprep.subr.bf16.mxu1 %v2356_v1 }
 0x14f   :  { %v1604_v20 = vpop.f32.mrb[0].mxu0 }
 0x150   :  { %v1605_v16 = vpop.f32.mrb[1].mxu0  ;;  %v1626_v18 = vpop.f32.mrb[0].mxu1 }
 0x151   :  { %v1606_v36 = vadd.f32 %v1605_v16, %v1604_v20  ;;  %v1607_v33 = vpop.f32.mrb[2].mxu0  ;;  %v1627_v41 = vpop.f32.mrb[1].mxu1 }
 0x152   :  { %v1608_v31 = vpop.f32.mrb[3].mxu0  ;;  %v1628_v44 = vadd.f32 %v1627_v41, %v1626_v18  ;;  %v1629_v45 = vpop.f32.mrb[2].mxu1  ;;  %v2956_v41 = vld [vmem:[#allocation22_spill] sm:$0xff] }
 0x153   :  { %v724_v27 = vadd.f32 %v1606_v36, %v2666_v29  ;;  %v1630_v43 = vpop.f32.mrb[3].mxu1  ;;  %v995_v31 = vcombine.high %v2613_v14, %v2613_v14  ;;  %v994_v14 = vcombine.high %v2640_v30, %v2640_v30  ;;  %v2963_v30 = vld [vmem:[#allocation29_spill] sm:$0xff]  ;;  %v1208_v45 = vld [vmem:[#allocation7] sm:$0xff] }
 0x155   :  { %v764_v25 = vadd.f32 %v1628_v44, %v724_v27  ;;  %v2955_v27 = vld [vmem:[#allocation21_spill] sm:$0xff]  ;;  %v1217_v44 = vrot.slane %v1208_v45, %v2442_v35 }
 0x157   :  { %v1225_v18 = vcombine.high %v1217_v44, %v1217_v44 }
 0x16f   :  { %v1648_v38 = vpop.f32.mrb[4].mxu0 }
 0x170   :  { %v1649_v1 = vpop.f32.mrb[5].mxu0  ;;  %v1670_v54 = vpop.f32.mrb[4].mxu1 }
 0x171   :  { %v1650_v50 = vadd.f32 %v1649_v1, %v1648_v38  ;;  %v1651_v47 = vpop.f32.mrb[6].mxu0  ;;  %v1671_v39 = vpop.f32.mrb[5].mxu1  ;;  %v2964_v38 = vld [vmem:[#allocation30_spill] sm:$0xff]  ;;  %v2731_v1 = vrot.slane %v1225_v18, %v2442_v35 }
 0x172   :  { %v1652_v24 = vpop.f32.mrb[7].mxu0  ;;  %v1672_v60 = vadd.f32 %v1671_v39, %v1670_v54  ;;  %v1673_v58 = vpop.f32.mrb[6].mxu1 }
 0x173   :  { %v804_v62 = vadd.f32 %v1650_v50, %v764_v25  ;;  %v1674_v20 = vpop.f32.mrb[7].mxu1  ;;  %v2954_v25 = vld [vmem:[#allocation20_spill] sm:$0xff]  ;;  %v2957_v58 = vld [vmem:[#allocation23_spill] sm:$0xff] }
 0x174   :  { %v2962_v24 = vld [vmem:[#allocation28_spill] sm:$0xff]  ;;  %v2734_v20 = vrot.slane %v1217_v44, %v2442_v35  ;;  %v2985_v44 = vld [vmem:[#allocation54_spill] sm:$0xff] }
 0x175   :  { %v844_v33 = vadd.f32 %v1672_v60, %v804_v62  ;;  %v2959_v60 = vld [vmem:[#allocation25_spill] sm:$0xff] }
 0x177   :  { %v849_v16 = vmax.f32 %v844_v33, 0.0  ;;  %v2965_v33 = vld [vmem:[#allocation31_spill] sm:$0xff] }
 0x179   :  { %v850_v36 = vpack.c.bf16 %v849_v16, %v849_v16  ;;  %v2966_v16 = vld [vmem:[#allocation32_spill] sm:$0xff] }
 0x17b   :  { %1896 = vmatmul.mubr.bf16.vlgmr.msra.gmra.mrb[8].mxu0 %v850_v36  ;;  %v2968_v36 = vld [vmem:[#allocation34_spill] sm:$0xff] }
 0x17c   :  { %1708 = vmatpush3.bf16.msra.mxu0 %v2362_v3  ;;  %1077 = vmatprep.mubr.bf16.mxu0 %v995_v31  ;;  %v993_v3 = vcombine.high %v2616_v12, %v2616_v12  ;;  %v2953_v12 = vld [vmem:[#allocation42_spill] sm:$0xff]  ;;  %v2967_v31 = vld [vmem:[#allocation33_spill] sm:$0xff] }
 0x17d   :  { %1709 = vmatprep.subr.bf16.mxu0 %v2368_v5  ;;  %v996_v5 = vcombine.high %v2636_v22, %v2636_v22 }
 0x180   :  { %1710 = vmatpush3.bf16.msra.mxu0 %v2374_v7  ;;  %v2950_v7 = vld [vmem:[#allocation36_spill] sm:$0xff] }
 0x181   :  { %1711 = vmatprep.subr.bf16.mxu0 %v2380_v9  ;;  %v2951_v9 = vld [vmem:[#allocation38_spill] sm:$0xff] }
 0x184   :  { %1712 = vmatpush3.bf16.msra.mxu0 %v2386_v11  ;;  %v2952_v11 = vld [vmem:[#allocation40_spill] sm:$0xff] }
 0x185   :  { %1713 = vmatprep.subr.bf16.mxu0 %v2392_v13 }
 0x188   :  { %1714 = vmatpush3.bf16.msra.mxu0 %v2398_v15 }
 0x189   :  { %1715 = vmatprep.subr.bf16.mxu0 %v2404_v17 }
 0x18c   :  { %1716 = vmatpush3.bf16.msra.mxu0 %v2410_v19 }
 0x18d   :  { %1717 = vmatprep.subr.bf16.mxu0 %v2416_v21 }
 0x190   :  { %1718 = vmatpush3.bf16.msra.mxu0 %v2422_v26 }
 0x191   :  { %1719 = vmatprep.subr.bf16.mxu0 %v2428_v28 }
 0x194   :  { %1720 = vmatpush3.bf16.msra.mxu0 %v2434_v32 }
 0x195   :  { %1721 = vmatprep.subr.bf16.mxu0 %v2440_v34 }
 0x198   :  { %1722 = vmatpush3.bf16.msra.mxu0 %v2448_v37 }
 0x199   :  { %1751 = vmatprep.subr.bf16.mxu0 %v2455_v42 }
 0x19b   :  { %1078 = vmatmul.mubr.bf16.vlgmr.msra.gmra.mrb[12].mxu0 %v993_v3  ;;  %v2969_v3 = vld [vmem:[#allocation35_spill] sm:$0xff] }
 0x19c   :  { %1752 = vmatpush3.bf16.msra.mxu0 %v2466_v48  ;;  %1157 = vmatprep.mubr.bf16.mxu0 %v996_v5  ;;  %v2970_v5 = vld [vmem:[#allocation37_spill] sm:$0xff] }
 0x19d   :  { %1753 = vmatprep.subr.bf16.mxu0 %v2472_v53 }
 0x1a0   :  { %1754 = vmatpush3.bf16.msra.mxu0 %v2478_v56 }
 0x1a1   :  { %1755 = vmatprep.subr.bf16.mxu0 %v2484_v59 }
 0x1a4   :  { %1756 = vmatpush3.bf16.msra.mxu0 %v2490_v61 }
 0x1a5   :  { %1757 = vmatprep.subr.bf16.mxu0 %v2496_v63 }
 0x1a8   :  { %1758 = vmatpush3.bf16.msra.mxu0 %v2502_v23 }
 0x1a9   :  { %1759 = vmatprep.subr.bf16.mxu0 %v2950_v7 }
 0x1ac   :  { %1760 = vmatpush3.bf16.msra.mxu0 %v2951_v9 }
 0x1ad   :  { %1761 = vmatprep.subr.bf16.mxu0 %v2952_v11 }
 0x1b0   :  { %1762 = vmatpush3.bf16.msra.mxu0 %v2953_v12 }
 0x1b1   :  { %1763 = vmatprep.subr.bf16.mxu0 %v2532_v49 }
 0x1b4   :  { %1764 = vmatpush3.bf16.msra.mxu0 %v2538_v52 }
 0x1b5   :  { %1765 = vmatprep.subr.bf16.mxu0 %v2544_v57 }
 0x1b8   :  { %1766 = vmatpush3.bf16.msra.mxu0 %v2550_v40 }
 0x1b9   :  { %1782 = vmatprep.subr.bf16.mxu0 %v2354_v0  ;;  %v2958_v0 = vld [vmem:[#allocation24_spill] sm:$0xff] }
 0x1bb   :  { %1158 = vmatmul.mubr.bf16.vlgmr.msra.gmra.mrb[16].mxu0 %v994_v14  ;;  %v2971_v14 = vld [vmem:[#allocation39_spill] sm:$0xff] }
 0x1bc   :  { %1783 = vmatpush3.bf16.msra.mxu0 %v2359_v2  ;;  %v2960_v2 = vld [vmem:[#allocation26_spill] sm:$0xff]  ;;  %1299 = vmatprep.mubr.bf16.mxu0 %v2731_v1 }
 0x1bd   :  { %1784 = vmatprep.subr.bf16.mxu0 %v2365_v4  ;;  %v1701_v4 = vpop.f32.mrb[8].mxu1 }
 0x1c0   :  { %1785 = vmatpush3.bf16.msra.mxu0 %v2371_v6  ;;  %v1702_v6 = vpop.f32.mrb[9].mxu1 }
 0x1c1   :  { %1786 = vmatprep.subr.bf16.mxu0 %v2377_v8  ;;  %v2721_v62 = vadd.f32 %v1702_v6, %v1701_v4  ;;  %v1704_v8 = vpop.f32.mrb[10].mxu1  ;;  %v2977_v4 = vmov 0.0   ;;  %v2978_v6 = vld [vmem:[#allocation47_spill] sm:$0xff] }
 0x1c2   :  { %v1705_v22 = vpop.f32.mrb[11].mxu1  ;;  %v2979_v8 = vld [vmem:[#allocation48_spill] sm:$0xff] }
 0x1c3   :  { %v1745_v39 = vpop.f32.mrb[12].mxu1  ;;  %v2776_v22 = vld [vmem:[%s2868_s6] ss:$0 sm:$0xff]  ;;  %v1040_v18 = vadd.f32 %v2721_v62, %v2666_v29  ;;  %v2027_v62 = vld [vmem:[#allocation8 + $0x80] sm:$0xff]   ;;  %s2228_s6 = smov [#allocation12]  }
 0x1c4   :  { %1787 = vmatpush3.bf16.msra.mxu0 %v2383_v10  ;;  %v2961_v10 = vld [vmem:[#allocation27_spill] sm:$0xff]  ;;  %v1746_v43 = vpop.f32.mrb[13].mxu1  ;;  %s1486_s25 = sshll.u32 %s2228_s6, 4  ;;  %s1487_s25 = int_to_ptr.vmem [resolvable:$true] %s1486_s25 }
 0x1c5   :  { %1788 = vmatprep.subr.bf16.mxu0 %v2954_v25  ;;  %v2727_v47 = vadd.f32 %v1746_v43, %v1745_v39  ;;  %v1748_v50 = vpop.f32.mrb[14].mxu1  ;;  %v2972_v25 = vld [vmem:[#allocation41_spill] sm:$0xff]  ;;  %s2142_s28 = scalar_lea.vmem %s1487_s25, 32  ;;  %p2147_p13 = scmp.lt.s32.totalorder %s1487_s25, %s1487_s25 }
 0x1c6   :  { %v1749_v54 = vpop.f32.mrb[15].mxu1  ;;  %v2983_v50 = vld [vmem:[#allocation52_spill] sm:$0xff]  ;;  %p2143_p12 = scmp.ne.s32.totalorder %s1487_s25, %s2142_s28  ;;  %p2148_p0 = scmp.lt.s32.totalorder %s2142_s28, %s2142_s28 }
 0x1c8   :  { %1789 = vmatpush3.bf16.msra.mxu0 %v2955_v27  ;;  %v2974_v27 = vld [vmem:[#allocation44_spill] sm:$0xff]  ;;  %p2149_p1 = por %p2148_p0, %p2147_p13 }
 0x1c9   :  { %1790 = vmatprep.subr.bf16.mxu0 %v2956_v41  ;;  %v2975_v41 = vld [vmem:[#allocation45_spill] sm:$0xff] }
 0x1ca   :  { %p2150_p2 = pnand %p2149_p1, %p2143_p12 }
 0x1cc   :  { %1791 = vmatpush3.bf16.msra.mxu0 %v2957_v58 }
 0x1cd   :  { %1792 = vmatprep.subr.bf16.mxu0 %v2958_v0 }
 0x1d0   :  { %1793 = vmatpush3.bf16.msra.mxu0 %v2959_v60  ;;  %v2976_v60 = vld [vmem:[#allocation46_spill] sm:$0xff] }
 0x1d1   :  { %1794 = vmatprep.subr.bf16.mxu0 %v2960_v2 }
 0x1d4   :  { %1795 = vmatpush3.bf16.msra.mxu0 %v2961_v10  ;;  %v2980_v10 = vld [vmem:[#allocation49_spill] sm:$0xff] }
 0x1d5   :  { %1796 = vmatprep.subr.bf16.mxu0 %v2962_v24  ;;  %v2982_v24 = vld [vmem:[#allocation51_spill] sm:$0xff] }
 0x1d8   :  { %1797 = vmatpush3.bf16.msra.mxu0 %v2963_v30 }
 0x1d9   :  { %1826 = vmatprep.subr.bf16.mxu0 %v2964_v38 }
 0x1db   :  { %1300 = vmatmul.mubr.bf16.vlgmr.msra.gmra.mrb[20].mxu0 %v2734_v20 }
 0x1dc   :  { %1827 = vmatpush3.bf16.msra.mxu0 %v2463_v46  ;;  %v2973_v46 = vld [vmem:[#allocation43_spill] sm:$0xff] }
 0x1dd   :  { %1828 = vmatprep.subr.bf16.mxu0 %v2470_v51  ;;  %v1210_v51 = vcombine.high %v1208_v45, %v1208_v45  ;;  %v2984_v45 = vld [vmem:[#allocation53_spill] sm:$0xff] }
 0x1e0   :  { %1829 = vmatpush3.bf16.msra.mxu0 %v2475_v55  ;;  %v1224_v55 = vrot.slane %v1210_v51, %v2442_v35 }
 0x1e1   :  { %1830 = vmatprep.subr.bf16.mxu0 %v2965_v33 }
 0x1e2   :  { %v1226_v58 = vcombine.high %v1224_v55, %v1224_v55  ;;  %v2758_v2 = vrot.slane %v1224_v55, %v2442_v35 }
 0x1e4   :  { %1831 = vmatpush3.bf16.msra.mxu0 %v2966_v16  ;;  %v2754_v0 = vrot.slane %v1226_v58, %v2442_v35  ;;  %v2981_v35 = vld [vmem:[#allocation50_spill] sm:$0xff] }
 0x1e5   :  { %1832 = vmatprep.subr.bf16.mxu0 %v2967_v31 }
 0x1e6   :  { %1379 = vmatprep.mubr.bf16.mxu0 %v2754_v0 }
 0x1e8   :  { %1833 = vmatpush3.bf16.msra.mxu0 %v2968_v36 }
 0x1e9   :  { %1834 = vmatprep.subr.bf16.mxu0 %v2969_v3 }
 0x1ec   :  { %1835 = vmatpush3.bf16.msra.mxu0 %v2970_v5 }
 0x1ed   :  { %1836 = vmatprep.subr.bf16.mxu0 %v2971_v14 }
 0x1f0   :  { %1837 = vmatpush3.bf16.msra.mxu0 %v2972_v25 }
 0x1f1   :  { %1838 = vmatprep.subr.bf16.mxu0 %v2973_v46 }
 0x1f4   :  { %1839 = vmatpush3.bf16.msra.mxu0 %v2974_v27 }
 0x1f5   :  { %1840 = vmatprep.subr.bf16.mxu0 %v2975_v41 }
 0x1f8   :  { %1841 = vmatpush3.bf16.msra.mxu0 %v2976_v60  ;;  %v1257_v60 = vcombine.high %v2731_v1, %v2731_v1  ;;  %v1255_v1 = vcombine.high %v2734_v20, %v2734_v20 }
 0x1f9   :  { %1919 = vmatprep.subr.bf16.mxu0 %v2977_v4 }
 0x1fb   :  { %1380 = vmatmul.mubr.bf16.vlgmr.msra.gmra.mrb[24].mxu0 %v2758_v2 }
 0x1fc   :  { %1920 = vmatpush3.bf16.msra.mxu0 %v2978_v6  ;;  %1935 = vmatprep.mubr.msk.bf16.mxu0 %vm2227_vm0, %v2977_v4  ;;  %v2028_v6 = vld [vmem:[#allocation8 + $0xc8] sm:$0xff]  }
 0x1fd   :  { %1921 = vmatprep.subr.bf16.mxu0 %v2977_v4 }
 0x200   :  { %1922 = vmatpush3.bf16.msra.mxu0 %v2979_v8  ;;  %v2029_v8 = vld [vmem:[#allocation8 + $0x88] sm:$0xff]  }
 0x201   :  { %1923 = vmatprep.subr.bf16.mxu0 %v2977_v4 }
 0x204   :  { %1924 = vmatpush3.bf16.msra.mxu0 %v2980_v10  ;;  %v2031_v10 = vld [vmem:[#allocation8 + $0x90] sm:$0xff]  }
 0x205   :  { %1925 = vmatprep.subr.bf16.mxu0 %v2977_v4 }
 0x208   :  { %1926 = vmatpush3.bf16.msra.mxu0 %v2981_v35 }
 0x209   :  { %1927 = vmatprep.subr.bf16.mxu0 %v2977_v4 }
 0x20c   :  { %1928 = vmatpush3.bf16.msra.mxu0 %v2982_v24 }
 0x20d   :  { %1929 = vmatprep.subr.bf16.mxu0 %v2977_v4 }
 0x210   :  { %1930 = vmatpush3.bf16.msra.mxu0 %v2983_v50 }
 0x211   :  { %1931 = vmatprep.subr.bf16.mxu0 %v2977_v4 }
 0x214   :  { %1932 = vmatpush3.bf16.msra.mxu0 %v2984_v45 }
 0x215   :  { %1933 = vmatprep.subr.bf16.mxu0 %v2977_v4 }
 0x218   :  { %1934 = vmatpush3.bf16.msra.mxu0 %v2985_v44 }
 0x24e   :  { %v939_v30 = vpop.f32.mrb[8].mxu0 }
 0x24f   :  { %v940_v38 = vadd.f32 %v2776_v22, %v939_v30  ;;  %v1897_v39 = vpop.f32.mrb[9].mxu0 }
 0x250   :  { %v942_v43 = vpop.f32.mrb[10].mxu0 }
 0x251   :  { %945 = vst [vmem:[#allocation11] sm:$0x3] %v940_v38  ;;  %v1898_v54 = vpop.f32.mrb[11].mxu0 }
 0x26e   :  { %v1723_v33 = vpop.f32.mrb[12].mxu0 }
 0x26f   :  { %v1724_v16 = vpop.f32.mrb[13].mxu0 }
 0x270   :  { %v1725_v31 = vadd.f32 %v1724_v16, %v1723_v33  ;;  %v1726_v36 = vpop.f32.mrb[14].mxu0 }
 0x271   :  { %v1727_v3 = vpop.f32.mrb[15].mxu0 }
 0x272   :  { %v1080_v5 = vadd.f32 %v1725_v31, %v1040_v18 }
 0x274   :  { %v1120_v14 = vadd.f32 %v2727_v47, %v1080_v5  ;;  %v2030_v47 = vld [vmem:[#allocation8 + $0xd0] sm:$0xff]  }
 0x28e   :  { %v1767_v25 = vpop.f32.mrb[16].mxu0 }
 0x28f   :  { %v1768_v46 = vpop.f32.mrb[17].mxu0 }
 0x290   :  { %v1769_v51 = vadd.f32 %v1768_v46, %v1767_v25  ;;  %v1770_v55 = vpop.f32.mrb[18].mxu0 }
 0x291   :  { %v1771_v27 = vpop.f32.mrb[19].mxu0 }
 0x292   :  { %v1160_v41 = vadd.f32 %v1769_v51, %v1120_v14 }
 0x294   :  { %v1165_v58 = vmax.f32 %v1160_v41, 0.0 }
 0x296   :  { %v1166_v4 = vpack.c.bf16 %v1165_v58, %v1165_v58 }
 0x298   :  { %1916 = vmatmul.mubr.bf16.vlgmr.msra.gmra.mrb[16].mxu1 %v1166_v4 }
 0x299   :  { %1805 = vmatpush3.bf16.msra.mxu1 %v2027_v62  ;;  %1339 = vmatprep.mubr.bf16.mxu1 %v1257_v60 }
 0x29a   :  { %1806 = vmatprep.subr.bf16.mxu1 %v2028_v6 }
 0x29d   :  { %1807 = vmatpush3.bf16.msra.mxu1 %v2029_v8 }
 0x29e   :  { %1808 = vmatprep.subr.bf16.mxu1 %v2030_v47 }
 0x2a1   :  { %1809 = vmatpush3.bf16.msra.mxu1 %v2031_v10 }
 0x2a2   :  { %1810 = vmatprep.subr.bf16.mxu1 %v2392_v13  ;;  %v1258_v13 = vcombine.high %v2754_v0, %v2754_v0 }
 0x2a5   :  { %1811 = vmatpush3.bf16.msra.mxu1 %v2398_v15  ;;  %v1256_v15 = vcombine.high %v2758_v2, %v2758_v2 }
 0x2a6   :  { %1812 = vmatprep.subr.bf16.mxu1 %v2404_v17 }
 0x2a9   :  { %1813 = vmatpush3.bf16.msra.mxu1 %v2410_v19 }
 0x2aa   :  { %1814 = vmatprep.subr.bf16.mxu1 %v2416_v21 }
 0x2ad   :  { %1815 = vmatpush3.bf16.msra.mxu1 %v2422_v26 }
 0x2ae   :  { %1816 = vmatprep.subr.bf16.mxu1 %v2428_v28  ;;  %v1798_v17 = vpop.f32.mrb[20].mxu0 }
 0x2af   :  { %v1799_v19 = vpop.f32.mrb[21].mxu0 }
 0x2b0   :  { %v1800_v21 = vadd.f32 %v1799_v19, %v1798_v17  ;;  %v1801_v26 = vpop.f32.mrb[22].mxu0 }
 0x2b1   :  { %1817 = vmatpush3.bf16.msra.mxu1 %v2434_v32  ;;  %v1802_v28 = vpop.f32.mrb[23].mxu0 }
 0x2b2   :  { %1818 = vmatprep.subr.bf16.mxu1 %v2440_v34 }
 0x2b5   :  { %1819 = vmatpush3.bf16.msra.mxu1 %v2448_v37 }
 0x2b6   :  { %1848 = vmatprep.subr.bf16.mxu1 %v2455_v42 }
 0x2b8   :  { %1340 = vmatmul.mubr.bf16.vlgmr.msra.gmra.mrb[20].mxu1 %v1255_v1 }
 0x2b9   :  { %1849 = vmatpush3.bf16.msra.mxu1 %v2466_v48  ;;  %1419 = vmatprep.mubr.bf16.mxu1 %v1258_v13 }
 0x2ba   :  { %1850 = vmatprep.subr.bf16.mxu1 %v2472_v53 }
 0x2bd   :  { %1851 = vmatpush3.bf16.msra.mxu1 %v2478_v56 }
 0x2be   :  { %1852 = vmatprep.subr.bf16.mxu1 %v2484_v59 }
 0x2c1   :  { %1853 = vmatpush3.bf16.msra.mxu1 %v2490_v61 }
 0x2c2   :  { %1854 = vmatprep.subr.bf16.mxu1 %v2496_v63 }
 0x2c5   :  { %1855 = vmatpush3.bf16.msra.mxu1 %v2502_v23  ;;  %v1302_v23 = vadd.f32 %v1800_v21, %v2666_v29 }
 0x2c6   :  { %1856 = vmatprep.subr.bf16.mxu1 %v2950_v7 }
 0x2c9   :  { %1857 = vmatpush3.bf16.msra.mxu1 %v2951_v9 }
 0x2ca   :  { %1858 = vmatprep.subr.bf16.mxu1 %v2952_v11 }
 0x2cd   :  { %1859 = vmatpush3.bf16.msra.mxu1 %v2953_v12 }
 0x2ce   :  { %1860 = vmatprep.subr.bf16.mxu1 %v2532_v49  ;;  %v1842_v32 = vpop.f32.mrb[24].mxu0 }
 0x2cf   :  { %v1843_v34 = vpop.f32.mrb[25].mxu0 }
 0x2d0   :  { %v1844_v37 = vadd.f32 %v1843_v34, %v1842_v32  ;;  %v1845_v42 = vpop.f32.mrb[26].mxu0 }
 0x2d1   :  { %1861 = vmatpush3.bf16.msra.mxu1 %v2538_v52  ;;  %v1846_v48 = vpop.f32.mrb[27].mxu0 }
 0x2d2   :  { %1862 = vmatprep.subr.bf16.mxu1 %v2544_v57 }
 0x2d5   :  { %1863 = vmatpush3.bf16.msra.mxu1 %v2550_v40 }
 0x2d8   :  { %1420 = vmatmul.mubr.bf16.vlgmr.msra.gmra.mrb[24].mxu1 %v1256_v15 }
 0x36b   :  { %v1201_v53 = vpop.f32.mrb[16].mxu1 }
 0x36c   :  { %v1202_v56 = vadd.f32 %v2776_v22, %v1201_v53  ;;  %v1917_v59 = vpop.f32.mrb[17].mxu1 }
 0x36d   :  { %v1204_v61 = vpop.f32.mrb[18].mxu1 }
 0x36e   :  { %1207 = vst [vmem:[#allocation12] sm:$0x3] %v1202_v56  ;;  %v1918_v63 = vpop.f32.mrb[19].mxu1 }
 0x38b   :  { %v1820_v40 = vpop.f32.mrb[20].mxu1 }
 0x38c   :  { %v1821_v49 = vpop.f32.mrb[21].mxu1 }
 0x38d   :  { %v1822_v52 = vadd.f32 %v1821_v49, %v1820_v40  ;;  %v1823_v57 = vpop.f32.mrb[22].mxu1 }
 0x38e   :  { %v1824_v7 = vpop.f32.mrb[23].mxu1 }
 0x38f   :  { %v1342_v9 = vadd.f32 %v1822_v52, %v1302_v23 }
 0x391   :  { %v1382_v11 = vadd.f32 %v1844_v37, %v1342_v9 }
 0x3ab   :  { %v1864_v12 = vpop.f32.mrb[24].mxu1 }
 0x3ac   :  { %v1865_v20 = vpop.f32.mrb[25].mxu1 }
 0x3ad   :  { %v1866_v0 = vadd.f32 %v1865_v20, %v1864_v12  ;;  %v1867_v2 = vpop.f32.mrb[26].mxu1 }
 0x3ae   :  { %v1868_v35 = vpop.f32.mrb[27].mxu1 }
 0x3af   :  { %v1422_v24 = vadd.f32 %v1866_v0, %v1382_v11 }
 0x3b1   :  { %v1427_v30 = vmax.f32 %v1422_v24, 0.0 }
 0x3b3   :  { %v1428_v38 = vpack.c.bf16 %v1427_v30, %v1427_v30 }
 0x3b5   :  { %1936 = vmatmul.mubr.bf16.vlgmr.msra.gmra.mrb[28].mxu0 %v1428_v38 }
 0x3b6   :  { %2153 = shalt.err (!%p2150_p2)
}
 0x3b7   :  { %s2154_s11 = scalar_lea.hbm %s2870_s8, 32 }
 0x3b8   :  { %p2155_p3 = scmp.ne.s32.totalorder %s2870_s8, %s2154_s11  ;;  %p2158_p4 = scmp.lt.u32.totalorder %s2154_s11, %s2870_s8 }
 0x3ba   :  { %p2160_p5 = pnand %p2158_p4, %p2155_p3 }
 0x3bc   :  { %2163 = shalt.err (!%p2160_p5)
}
 0x3bd   :  { %1489 = dma.vmem_to_hbm [thread:$0]  %s1487_s25, 32, %s2870_s8, [#allocation13]  }
 0x3be   :  { %s2164_s19 = scalar_lea.vmem %s1477_s27, 32  ;;  %p2169_p7 = scmp.lt.s32.totalorder %s1477_s27, %s1477_s27 }
 0x3bf   :  { %p2165_p6 = scmp.ne.s32.totalorder %s1477_s27, %s2164_s19  ;;  %p2170_p8 = scmp.lt.s32.totalorder %s2164_s19, %s2164_s19 }
 0x3c1   :  { %p2171_p9 = por %p2170_p8, %p2169_p7 }
 0x3c3   :  { %p2172_p10 = pnand %p2171_p9, %p2165_p6 }
 0x3c5   :  { %2175 = shalt.err (!%p2172_p10)
}
 0x3c6   :  { %s2176_s22 = scalar_lea.hbm %s2869_s7, 32 }
 0x3c7   :  { %p2177_p11 = scmp.ne.s32.totalorder %s2869_s7, %s2176_s22  ;;  %p2180_p12 = scmp.lt.u32.totalorder %s2176_s22, %s2869_s7 }
 0x3c9   :  { %p2182_p13 = pnand %p2180_p12, %p2177_p11 }
 0x3cb   :  { %2185 = shalt.err (!%p2182_p13)
}
 0x3cc   :  { %1479 = dma.vmem_to_hbm [thread:$0]  %s1477_s27, 32, %s2869_s7, [#allocation4]  }
 0x3cd   :  { %s2230_s17 = smov [#allocation14]  }
 0x3ce   :  { %s1496_s5 = sshll.u32 %s2230_s17, 4  ;;  %s1497_s5 = int_to_ptr.vmem [resolvable:$true] %s1496_s5 }
 0x3cf   :  { %s2186_s1 = scalar_lea.vmem %s1497_s5, 32  ;;  %p2191_p1 = scmp.lt.s32.totalorder %s1497_s5, %s1497_s5 }
 0x3d0   :  { %p2187_p0 = scmp.ne.s32.totalorder %s1497_s5, %s2186_s1  ;;  %p2192_p2 = scmp.lt.s32.totalorder %s2186_s1, %s2186_s1 }
 0x3d2   :  { %p2193_p3 = por %p2192_p2, %p2191_p1 }
 0x3d4   :  { %p2194_p4 = pnand %p2193_p3, %p2187_p0 }
 0x488   :  { %v1463_v29 = vpop.f32.mrb[28].mxu0 }
 0x489   :  { %v1464_v39 = vadd.f32 %v2776_v22, %v1463_v29  ;;  %v1937_v43 = vpop.f32.mrb[29].mxu0 }
 0x48a   :  { %v1466_v50 = vpop.f32.mrb[30].mxu0 }
 0x48b   :  { %1469 = vst [vmem:[#allocation14] sm:$0x3] %v1464_v39  ;;  %v1938_v54 = vpop.f32.mrb[31].mxu0 }
 0x48c   :  { %2197 = shalt.err (!%p2194_p4)
}
 0x48d   :  { %s2198_s7 = scalar_lea.hbm %s2871_s9, 32 }
 0x48e   :  { %p2199_p5 = scmp.ne.s32.totalorder %s2871_s9, %s2198_s7  ;;  %p2202_p6 = scmp.lt.u32.totalorder %s2198_s7, %s2871_s9 }
 0x490   :  { %p2204_p7 = pnand %p2202_p6, %p2199_p5 }
 0x492   :  { %2207 = shalt.err (!%p2204_p7)
}
 0x493   :  { %1499 = dma.vmem_to_hbm [thread:$0]  %s1497_s5, 32, %s2871_s9, [#allocation13]  }
 0x494   :  { %2214 = dma.done.wait [#allocation4], 32  }
 0x495   :  { %2215 = vsyncadd [#allocation4], 4294967264 }
 0x496   :  { %2216 = dma.done.wait [#allocation13], 64  }
 0x497   :  { %2217 = vsyncadd [#allocation13], 4294967232 }
 0x498   :  { %1509 = vsyncpa [#allocation3], 1 }
 0x499   :  { %1510 = vsyncpa [#allocation6], 1 }
 0x49a   :  { %1511 = vsyncpa [#allocation9], 1 }
 0x49b   :  { %1512 = vsyncpa [#allocation4], 1 }
 0x49c   :  { %1513 = vsyncpa [#allocation13], 1 }

</bundles_post_ra>
